<compile_context>
chip_gen: v6e
topology: v6e:2x2x1
jax: 0.10.0
libtpu: 0.0.40
codegen_flags: <defaults>
</compile_context>

<pallas_src>
import functools

import jax
import jax.numpy as jnp
from jax.experimental import pallas as pl
from jax.experimental.pallas import tpu as pltpu

HIDDEN = 128   # fc1 output width
ENC = 2        # enc1 output width


def nn_forward_kernel(x_ref, w1_ref, b1_ref, w_enc_ref, b_enc_ref,
                      w_x_ref, b_x_ref, x_out_ref, enc_out_ref):
    # fc1 + ReLU.  In-kernel bf16 cast (VPU, hidden under the input DMA),
    # f32 accumulation on the MXU.
    # TODO(synk): nn.Dropout(0.2) is identity at inference; training-mode dropout
    # (random masking) is not implemented.
    xb = x_ref[...].astype(jnp.bfloat16)
    h = jnp.dot(xb, w1_ref[...], preferred_element_type=jnp.float32)
    h = jnp.maximum(h + b1_ref[...], 0.0)

    # enc1 (128 -> 2) on the otherwise-idle MXU, f32 operands/accumulate.
    enc_out_ref[...] = (
        jnp.dot(h, w_enc_ref[...], preferred_element_type=jnp.float32)
        + b_enc_ref[...])

    # fc3 pre-composed with enc1 in the wrapper: X = h @ (w2 @ w3) + (b2 @ w3 + b3),
    # algebraically identical to fc3(enc1(h)).
    # (self.act3 / LeakyReLU is defined but never applied in the PyTorch forward.)
    x_out_ref[...] = (
        jnp.dot(h, w_x_ref[...], preferred_element_type=jnp.float32)
        + b_x_ref[...])


@functools.partial(jax.jit, static_argnames=("block_b",))
def nn_forward(x, params, *, block_b=4096):
    """Whole forward pass in one pipelined Pallas call.

    x: (B, n_in) float32; params from init_params.
    Returns (X, X_enc) = ((B, n_out), (B, 2)).
    """
    B, n_in = x.shape
    n_out = params["w3"].shape[1]

    # Weights are tiny and VMEM-resident: cast once in the wrapper.
    w1 = params["w1"].astype(jnp.bfloat16)                       # (n_in, 128)
    b1 = params["b1"].astype(jnp.float32)                        # (1, 128)
    w_enc = params["w2"].astype(jnp.float32)                     # (128, 2)
    b_enc = params["b2"].astype(jnp.float32)                     # (1, 2)
    # Pre-compose enc1 + fc3 (one-time 128x2x n_out contraction on host/XLA).
    w_x = (params["w2"] @ params["w3"]).astype(jnp.float32)      # (128, n_out)
    b_x = (params["b2"] @ params["w3"]
           + params["b3"]).astype(jnp.float32)                   # (1, n_out)

    # Batch tile: keep the second-to-last block dim a multiple of 8 (layout rule)
    # unless it spans the whole batch.
    tb = min(block_b, B)
    if tb < B:
        tb = max((tb // 8) * 8, 8)
    grid = (pl.cdiv(B, tb),)
    const = lambda i: (0, 0)   # weights: same block every step -> VMEM-resident

    flops = 2 * B * (n_in * HIDDEN + HIDDEN * ENC + HIDDEN * n_out)
    bytes_accessed = (x.size * 4 + w1.size * 2
                      + 4 * (b1.size + w_enc.size + b_enc.size
                             + w_x.size + b_x.size)
                      + B * (n_out + ENC) * 4)

    X, X_enc = pl.pallas_call(
        nn_forward_kernel,
        out_shape=(jax.ShapeDtypeStruct((B, n_out), jnp.float32),
                   jax.ShapeDtypeStruct((B, ENC), jnp.float32)),
        grid=grid,
        in_specs=[
            pl.BlockSpec((tb, n_in), lambda i: (i, 0)),   # x: streamed over batch
            pl.BlockSpec((n_in, HIDDEN), const),          # w1 (resident, bf16)
            pl.BlockSpec((1, HIDDEN), const),             # b1
            pl.BlockSpec((HIDDEN, ENC), const),           # w2
            pl.BlockSpec((1, ENC), const),                # b2
            pl.BlockSpec((HIDDEN, n_out), const),         # w2 @ w3 (pre-composed)
            pl.BlockSpec((1, n_out), const),              # b2 @ w3 + b3
        ],
        out_specs=(pl.BlockSpec((tb, n_out), lambda i: (i, 0)),
                   pl.BlockSpec((tb, ENC), lambda i: (i, 0))),
        compiler_params=pltpu.CompilerParams(
            dimension_semantics=("parallel",)),           # megacore / 2-TC shard
        cost_estimate=pl.CostEstimate(
            flops=flops, transcendentals=0, bytes_accessed=bytes_accessed),
    )(x, w1, b1, w_enc, b_enc, w_x, b_x)
    return X, X_enc


def init_params(key, n_in, n_out):
    """Deterministic PyTorch-style uniform(-1/sqrt(fan_in), 1/sqrt(fan_in)) init."""
    ks = jax.random.split(key, 6)

    def lin(kw, kb, fan_in, fan_out):
        bound = 1.0 / jnp.sqrt(float(fan_in))
        w = jax.random.uniform(kw, (fan_in, fan_out), jnp.float32, -bound, bound)
        b = jax.random.uniform(kb, (1, fan_out), jnp.float32, -bound, bound)
        return w, b

    w1, b1 = lin(ks[0], ks[1], n_in, HIDDEN)
    w2, b2 = lin(ks[2], ks[3], HIDDEN, ENC)
    w3, b3 = lin(ks[4], ks[5], ENC, n_out)
    return {"w1": w1, "b1": b1, "w2": w2, "b2": b2, "w3": w3, "b3": b3}


def _reference(x, params):
    # Same intentional bf16 rounding on the fc1 operands as the kernel.
    h = jnp.maximum(
        jnp.dot(x.astype(jnp.bfloat16), params["w1"].astype(jnp.bfloat16),
                preferred_element_type=jnp.float32) + params["b1"], 0.0)
    enc = h @ params["w2"] + params["b2"]
    out = enc @ params["w3"] + params["b3"]
    return out, enc


if __name__ == "__main__":
    key = jax.random.PRNGKey(0)
    k_x, k_p, k_x2 = jax.random.split(key, 3)

    B, n_in, n_out = 32, 32, 4
    x = jax.random.normal(k_x, (B, n_in), jnp.float32)
    params = init_params(k_p, n_in, n_out)

    # Small batch tile so the demo exercises the batch grid (2 steps) with
    # VMEM-resident weights.
    X, X_enc = nn_forward(x, params, block_b=16)
    jax.block_until_ready((X, X_enc))

    out_ref, enc_ref = _reference(x, params)
    assert X.shape == (B, n_out) and X_enc.shape == (B, ENC)
    assert jnp.allclose(X_enc, enc_ref, atol=2e-3, rtol=2e-3), "X_enc mismatch"
    assert jnp.allclose(X, out_ref, atol=2e-3, rtol=2e-3), "X mismatch"

    # Ragged batch (B % tb != 0): exercises the padded last block.
    B2 = 20
    x2 = jax.random.normal(k_x2, (B2, n_in), jnp.float32)
    X2, X2_enc = nn_forward(x2, params, block_b=16)
    jax.block_until_ready((X2, X2_enc))
    out2_ref, enc2_ref = _reference(x2, params)
    assert jnp.allclose(X2_enc, enc2_ref, atol=2e-3, rtol=2e-3), "ragged X_enc mismatch"
    assert jnp.allclose(X2, out2_ref, atol=2e-3, rtol=2e-3), "ragged X mismatch"

    print("KERNEL_OK")
</pallas_src>

<mosaic_0001>
module attributes {stable_mosaic.version = 11 : i64} {
  func.func @nn_forward_kernel(%arg0: i32, %arg1: memref<16x32xf32, #tpu.memory_space<vmem>>, %arg2: memref<32x128xbf16, #tpu.memory_space<vmem>>, %arg3: memref<1x128xf32, #tpu.memory_space<vmem>>, %arg4: memref<128x2xf32, #tpu.memory_space<vmem>>, %arg5: memref<1x2xf32, #tpu.memory_space<vmem>>, %arg6: memref<128x4xf32, #tpu.memory_space<vmem>>, %arg7: memref<1x4xf32, #tpu.memory_space<vmem>>, %arg8: memref<16x4xf32, #tpu.memory_space<vmem>>, %arg9: memref<16x2xf32, #tpu.memory_space<vmem>>) attributes {dimension_semantics = [#tpu.dimension_semantics<parallel>], iteration_bounds = array<i64: 2>, scalar_prefetch = 0 : i64, scratch_operands = 0 : i64, tpu.core_type = #tpu.core_type<tc>, window_params = [{transform_indices = @transform_0, window_bounds = array<i64: 16, 32>}, {pipeline_mode = #tpu.pipeline_mode<synchronous>, transform_indices = @transform_1, window_bounds = array<i64: 32, 128>}, {pipeline_mode = #tpu.pipeline_mode<synchronous>, transform_indices = @transform_2, window_bounds = array<i64: 1, 128>}, {pipeline_mode = #tpu.pipeline_mode<synchronous>, transform_indices = @transform_3, window_bounds = array<i64: 128, 2>}, {pipeline_mode = #tpu.pipeline_mode<synchronous>, transform_indices = @transform_4, window_bounds = array<i64: 1, 2>}, {pipeline_mode = #tpu.pipeline_mode<synchronous>, transform_indices = @transform_5, window_bounds = array<i64: 128, 4>}, {pipeline_mode = #tpu.pipeline_mode<synchronous>, transform_indices = @transform_6, window_bounds = array<i64: 1, 4>}, {transform_indices = @transform_7, window_bounds = array<i64: 16, 4>}, {transform_indices = @transform_8, window_bounds = array<i64: 16, 2>}]} {
    %c0 = arith.constant 0 : index
    %c0_0 = arith.constant 0 : index
    %0 = vector.load %arg1[%c0, %c0_0] : memref<16x32xf32, #tpu.memory_space<vmem>>, vector<16x32xf32>
    %1 = arith.truncf %0 : vector<16x32xf32> to vector<16x32xbf16>
    %c0_1 = arith.constant 0 : index
    %c0_2 = arith.constant 0 : index
    %2 = vector.load %arg2[%c0_1, %c0_2] : memref<32x128xbf16, #tpu.memory_space<vmem>>, vector<32x128xbf16>
    %cst = arith.constant dense<0.000000e+00> : vector<16x128xf32>
    %3 = tpu.matmul %1, %2, %cst {dimension_numbers = #tpu.dot_dimension_numbers<[1], [0], [0], [1], [0, 0, 1, 1], [], []>} : vector<16x32xbf16>, vector<32x128xbf16>, vector<16x128xf32> -> vector<16x128xf32>
    %c0_3 = arith.constant 0 : index
    %c0_4 = arith.constant 0 : index
    %4 = vector.load %arg3[%c0_3, %c0_4] : memref<1x128xf32, #tpu.memory_space<vmem>>, vector<1x128xf32>
    %5 = vector.broadcast %4 : vector<1x128xf32> to vector<16x128xf32>
    %6 = arith.addf %3, %5 : vector<16x128xf32>
    %cst_5 = arith.constant 0.000000e+00 : f32
    %7 = vector.broadcast %cst_5 : f32 to vector<16x128xf32>
    %8 = arith.maximumf %6, %7 : vector<16x128xf32>
    %c0_6 = arith.constant 0 : index
    %c0_7 = arith.constant 0 : index
    %9 = vector.load %arg4[%c0_6, %c0_7] : memref<128x2xf32, #tpu.memory_space<vmem>>, vector<128x2xf32>
    %cst_8 = arith.constant dense<0.000000e+00> : vector<16x2xf32>
    %10 = tpu.matmul %8, %9, %cst_8 {dimension_numbers = #tpu.dot_dimension_numbers<[1], [0], [0], [1], [0, 0, 1, 1], [], []>} : vector<16x128xf32>, vector<128x2xf32>, vector<16x2xf32> -> vector<16x2xf32>
    %c0_9 = arith.constant 0 : index
    %c0_10 = arith.constant 0 : index
    %11 = vector.load %arg5[%c0_9, %c0_10] : memref<1x2xf32, #tpu.memory_space<vmem>>, vector<1x2xf32>
    %12 = vector.broadcast %11 : vector<1x2xf32> to vector<16x2xf32>
    %13 = arith.addf %10, %12 : vector<16x2xf32>
    %c0_11 = arith.constant 0 : index
    %c0_12 = arith.constant 0 : index
    %14 = vector.load %arg9[%c0_11, %c0_12] : memref<16x2xf32, #tpu.memory_space<vmem>>, vector<16x2xf32>
    tpu.vector_store %arg9[%c0_11, %c0_12], %13 {strides = array<i32>} : memref<16x2xf32, #tpu.memory_space<vmem>>, vector<16x2xf32>,
    %c0_13 = arith.constant 0 : index
    %c0_14 = arith.constant 0 : index
    %15 = vector.load %arg6[%c0_13, %c0_14] : memref<128x4xf32, #tpu.memory_space<vmem>>, vector<128x4xf32>
    %cst_15 = arith.constant dense<0.000000e+00> : vector<16x4xf32>
    %16 = tpu.matmul %8, %15, %cst_15 {dimension_numbers = #tpu.dot_dimension_numbers<[1], [0], [0], [1], [0, 0, 1, 1], [], []>} : vector<16x128xf32>, vector<128x4xf32>, vector<16x4xf32> -> vector<16x4xf32>
    %c0_16 = arith.constant 0 : index
    %c0_17 = arith.constant 0 : index
    %17 = vector.load %arg7[%c0_16, %c0_17] : memref<1x4xf32, #tpu.memory_space<vmem>>, vector<1x4xf32>
    %18 = vector.broadcast %17 : vector<1x4xf32> to vector<16x4xf32>
    %19 = arith.addf %16, %18 : vector<16x4xf32>
    %c0_18 = arith.constant 0 : index
    %c0_19 = arith.constant 0 : index
    %20 = vector.load %arg8[%c0_18, %c0_19] : memref<16x4xf32, #tpu.memory_space<vmem>>, vector<16x4xf32>
    tpu.vector_store %arg8[%c0_18, %c0_19], %19 {strides = array<i32>} : memref<16x4xf32, #tpu.memory_space<vmem>>, vector<16x4xf32>,
    return
  }
  func.func @transform_0(%arg0: i32) -> (i32, i32) {
    %c0_i32 = arith.constant 0 : i32
    %c0_i32_0 = arith.constant 0 : i32
    return %arg0, %c0_i32 : i32, i32
  }
  func.func @transform_1(%arg0: i32) -> (i32, i32) {
    %c0_i32 = arith.constant 0 : i32
    %c0_i32_0 = arith.constant 0 : i32
    %c0_i32_1 = arith.constant 0 : i32
    return %c0_i32, %c0_i32_0 : i32, i32
  }
  func.func @transform_2(%arg0: i32) -> (i32, i32) {
    %c0_i32 = arith.constant 0 : i32
    %c0_i32_0 = arith.constant 0 : i32
    %c0_i32_1 = arith.constant 0 : i32
    return %c0_i32, %c0_i32_0 : i32, i32
  }
  func.func @transform_3(%arg0: i32) -> (i32, i32) {
    %c0_i32 = arith.constant 0 : i32
    %c0_i32_0 = arith.constant 0 : i32
    %c0_i32_1 = arith.constant 0 : i32
    return %c0_i32, %c0_i32_0 : i32, i32
  }
  func.func @transform_4(%arg0: i32) -> (i32, i32) {
    %c0_i32 = arith.constant 0 : i32
    %c0_i32_0 = arith.constant 0 : i32
    %c0_i32_1 = arith.constant 0 : i32
    return %c0_i32, %c0_i32_0 : i32, i32
  }
  func.func @transform_5(%arg0: i32) -> (i32, i32) {
    %c0_i32 = arith.constant 0 : i32
    %c0_i32_0 = arith.constant 0 : i32
    %c0_i32_1 = arith.constant 0 : i32
    return %c0_i32, %c0_i32_0 : i32, i32
  }
  func.func @transform_6(%arg0: i32) -> (i32, i32) {
    %c0_i32 = arith.constant 0 : i32
    %c0_i32_0 = arith.constant 0 : i32
    %c0_i32_1 = arith.constant 0 : i32
    return %c0_i32, %c0_i32_0 : i32, i32
  }
  func.func @transform_7(%arg0: i32) -> (i32, i32) {
    %c0_i32 = arith.constant 0 : i32
    %c0_i32_0 = arith.constant 0 : i32
    return %arg0, %c0_i32 : i32, i32
  }
  func.func @transform_8(%arg0: i32) -> (i32, i32) {
    %c0_i32 = arith.constant 0 : i32
    %c0_i32_0 = arith.constant 0 : i32
    return %arg0, %c0_i32 : i32, i32
  }
}

</mosaic_0001>

<bundles_post_ra>
// kernel: nn_forward.1
= control target key start
LH: loop header
LB: loop body
LE: loop exit
PB: predicated region body
PF: predicated region fallthrough
CT: control target
= control target key end

     0   :  { %s892_s27 = smov 0   ;;  %s1028_s0 = inlined_call_operand.vmem [shape: f32[32,32], index: 0, kind: input, shape index: {}]   ;;  %s1029_s1 = inlined_call_operand.vmem [shape: bf16[32,128], index: 1, kind: input, shape index: {}]   ;;  %s1030_s2 = inlined_call_operand.vmem [shape: f32[1,128], index: 2, kind: input, shape index: {}]   ;;  %s1031_s3 = inlined_call_operand.vmem [shape: f32[128,2], index: 3, kind: input, shape index: {}]   ;;  %s1032_s4 = inlined_call_operand.vmem [shape: f32[1,2], index: 4, kind: input, shape index: {}]   ;;  %s1033_s5 = inlined_call_operand.vmem [shape: f32[128,4], index: 5, kind: input, shape index: {}]   ;;  %s1034_s6 = inlined_call_operand.vmem [shape: f32[1,4], index: 6, kind: input, shape index: {}]   ;;  %s1035_s7 = inlined_call_operand.vmem [shape: f32[32,4], index: 7, kind: output, shape index: {0}]   ;;  %s1036_s8 = inlined_call_operand.vmem [shape: f32[32,2], index: 8, kind: output, shape index: {1}]  }
   0x1 LB: > { %s689_s28 = sadd.s32 4294967295, %s843_s27   ;;  %p693_p0 = scmp.ge.s32.totalorder %s843_s27, 1  ;;  %s843_s27 = sphi %s892_s27, %s19_s27  }
   0x2   : > { %p266_p1 = scmp.lt.s32.totalorder %s843_s27, 3 }
   0x4   : > { %p267_p2 = pnand %p693_p0, %p266_p1 }
   0x5   : > { %s694_s11 = sshll.u32 (!%p267_p2), %s689_s28, 1 }
   0x6   : > { %270 = sbr.rel (%p267_p2) target bundleno = 420 (0x1a4), region = 48  ;;  %p306_p3 = scmp.lt.s32.totalorder (!%p267_p2), %s694_s11, 3 }
   0xb   : > { %v835_v0 = vld [vmem:[%s1029_s1 + $0x8] sm:$0xff]   ;;  %v845_v1 = vmov 0.0   ;;  %v836_v2 = vld [vmem:[%s1029_s1] sm:$0xff]   ;;  %vm846_vm0 = vmmov 0   ;;  %v412_v3 = vld [vmem:[%s1031_s3 + $0x78] sm:$0xff]  ;;  %s1038_s11 = smov (!%p306_p3, %s694_s11), 3 }
   0xc   : > { %747 = vmatprep.subr.bf16.mxu0 %v845_v1  ;;  %751 = vmatprep.mubr.msk.bf16.mxu0 %vm846_vm0, %v845_v1  ;;  %v411_v4 = vld [vmem:[%s1031_s3 + $0x70] sm:$0xff]  ;;  %v513_v5 = vld [vmem:[%s1033_s5 + $0x78] sm:$0xff]  ;;  %v410_v6 = vld [vmem:[%s1031_s3 + $0x68] sm:$0xff]  ;;  %s921_s22 = sshll.u32 %s1038_s11, 3  ;;  %vm350_vm1 = vcmask 261120   ;;  %vm495_vm2 = vcmask 15360  }
   0xd   : > { %748 = vmatpush3.bf16.msra.mxu0 %v835_v0  ;;  %755 = vmatprep.subr.mxu1 %v412_v3  ;;  %v409_v7 = vld [vmem:[%s1031_s3 + $0x60] sm:$0xff]  ;;  %s309_s25 = scalar_lea.vmem %s1028_s0, %s921_s22  ;;  %v408_v8 = vld [vmem:[%s1031_s3 + $0x58] sm:$0xff]  ;;  %v407_v12 = vld [vmem:[%s1031_s3 + $0x50] sm:$0xff]  ;;  %s321_s29 = scalar_lea.vmem %s1036_s8, %s921_s22  ;;  %vm596_vm3 = vcmask 31744  }
   0xe   : > { %749 = vmatprep.subr.bf16.mxu0 %v845_v1  ;;  %756 = vmatpush3.msra.mxu1 %v412_v3  ;;  %v324_v9 = vld [vmem:[%s309_s25] sm:$0xff]  ;;  %v325_v10 = vld [vmem:[%s309_s25 + $0x8] sm:$0xff]  ;;  %v512_v13 = vld [vmem:[%s1033_s5 + $0x70] sm:$0xff]  ;;  %s315_s10 = scalar_lea.vmem %s1035_s7, %s921_s22 }
   0xf   : > { %757 = vmatprep.subr.mxu1 %v411_v4  ;;  %v326_v11 = vpack.c.bf16 %v325_v10, %v324_v9  ;;  %v406_v14 = vld [vmem:[%s1031_s3 + $0x48] sm:$0xff]  ;;  %v405_v16 = vld [vmem:[%s1031_s3 + $0x40] sm:$0xff]  ;;  %v404_v18 = vld [vmem:[%s1031_s3 + $0x38] sm:$0xff] }
  0x10   : > { %758 = vmatpush3.msra.mxu1 %v411_v4  ;;  %v511_v15 = vld [vmem:[%s1033_s5 + $0x68] sm:$0xff]  ;;  %v510_v17 = vld [vmem:[%s1033_s5 + $0x60] sm:$0xff]  ;;  %v509_v19 = vld [vmem:[%s1033_s5 + $0x58] sm:$0xff] }
  0x11   : > { %750 = vmatpush3.bf16.msra.mxu0 %v836_v2  ;;  %759 = vmatprep.subr.mxu1 %v410_v6  ;;  %v403_v20 = vld [vmem:[%s1031_s3 + $0x30] sm:$0xff]  ;;  %v402_v22 = vld [vmem:[%s1031_s3 + $0x28] sm:$0xff]  ;;  %v401_v24 = vld [vmem:[%s1031_s3 + $0x20] sm:$0xff] }
  0x12   : > { %790 = vmatprep.subr.mxu0 %v513_v5  ;;  %760 = vmatpush3.msra.mxu1 %v410_v6  ;;  %v508_v21 = vld [vmem:[%s1033_s5 + $0x50] sm:$0xff]  ;;  %v507_v23 = vld [vmem:[%s1033_s5 + $0x48] sm:$0xff]  ;;  %v506_v25 = vld [vmem:[%s1033_s5 + $0x40] sm:$0xff] }
  0x13   : > { %761 = vmatprep.subr.mxu1 %v409_v7  ;;  %v505_v26 = vld [vmem:[%s1033_s5 + $0x38] sm:$0xff]  ;;  %v504_v27 = vld [vmem:[%s1033_s5 + $0x30] sm:$0xff]  ;;  %v503_v28 = vld [vmem:[%s1033_s5 + $0x28] sm:$0xff] }
  0x14   : > { %762 = vmatpush3.msra.mxu1 %v409_v7  ;;  %752 = vmatmul.mubr.msk.bf16.vlgmr.msra.gmra.mxu0 %vm350_vm1, %v326_v11  ;;  %v502_v29 = vld [vmem:[%s1033_s5 + $0x20] sm:$0xff]  ;;  %v400_v30 = vld [vmem:[%s1031_s3 + $0x18] sm:$0xff]  ;;  %v399_v32 = vld [vmem:[%s1031_s3 + $0x10] sm:$0xff] }
  0x15   : > { %763 = vmatprep.subr.mxu1 %v408_v8  ;;  %791 = vmatpush3.msra.mxu0 %v513_v5  ;;  %v501_v31 = vld [vmem:[%s1033_s5 + $0x18] sm:$0xff]  ;;  %v500_v33 = vld [vmem:[%s1033_s5 + $0x10] sm:$0xff]  ;;  %v398_v34 = vld [vmem:[%s1031_s3 + $0x8] sm:$0xff] }
  0x16   : > { %764 = vmatpush3.msra.mxu1 %v408_v8  ;;  %792 = vmatprep.subr.mxu0 %v512_v13  ;;  %v499_v35 = vld [vmem:[%s1033_s5 + $0x8] sm:$0xff]  ;;  %v397_v36 = vld [vmem:[%s1031_s3] sm:$0xff] }
  0x17   : > { %765 = vmatprep.subr.mxu1 %v407_v12  ;;  %793 = vmatpush3.msra.mxu0 %v512_v13  ;;  %v498_v37 = vld [vmem:[%s1033_s5] sm:$0xff] }
  0x18   : > { %766 = vmatpush3.msra.mxu1 %v407_v12  ;;  %794 = vmatprep.subr.mxu0 %v511_v15  ;;  %v700_v38 = vld [vmem:[%s1030_s2] ss:$0 sm:$0xff] }
  0x19   : > { %767 = vmatprep.subr.mxu1 %v406_v14  ;;  %795 = vmatpush3.msra.mxu0 %v511_v15  ;;  %v704_v49 = vld [vmem:[%s1032_s4] ss:$0 sm:$0xff] }
  0x1a   : > { %768 = vmatpush3.msra.mxu1 %v406_v14  ;;  %796 = vmatprep.subr.mxu0 %v510_v17  ;;  %v705_v50 = vld [vmem:[%s1034_s6] ss:$0 sm:$0xff] }
  0x1b   : > { %769 = vmatprep.subr.mxu1 %v405_v16  ;;  %797 = vmatpush3.msra.mxu0 %v510_v17 }
  0x1c   : > { %770 = vmatpush3.msra.mxu1 %v405_v16  ;;  %798 = vmatprep.subr.mxu0 %v509_v19 }
  0x1d   : > { %771 = vmatprep.subr.mxu1 %v404_v18  ;;  %799 = vmatpush3.msra.mxu0 %v509_v19 }
  0x1e   : > { %772 = vmatpush3.msra.mxu1 %v404_v18  ;;  %800 = vmatprep.subr.mxu0 %v508_v21 }
  0x1f   : > { %773 = vmatprep.subr.mxu1 %v403_v20  ;;  %801 = vmatpush3.msra.mxu0 %v508_v21 }
  0x20   : > { %774 = vmatpush3.msra.mxu1 %v403_v20  ;;  %802 = vmatprep.subr.mxu0 %v507_v23 }
  0x21   : > { %775 = vmatprep.subr.mxu1 %v402_v22  ;;  %803 = vmatpush3.msra.mxu0 %v507_v23 }
  0x22   : > { %776 = vmatpush3.msra.mxu1 %v402_v22  ;;  %804 = vmatprep.subr.mxu0 %v506_v25 }
  0x23   : > { %777 = vmatprep.subr.mxu1 %v401_v24  ;;  %805 = vmatpush3.msra.mxu0 %v506_v25 }
  0x24   : > { %778 = vmatpush3.msra.mxu1 %v401_v24  ;;  %806 = vmatprep.subr.mxu0 %v505_v26 }
  0x25   : > { %807 = vmatpush3.msra.mxu0 %v505_v26  ;;  %779 = vmatprep.subr.mxu1 %v400_v30 }
  0x26   : > { %808 = vmatprep.subr.mxu0 %v504_v27  ;;  %780 = vmatpush3.msra.mxu1 %v400_v30 }
  0x27   : > { %809 = vmatpush3.msra.mxu0 %v504_v27  ;;  %781 = vmatprep.subr.mxu1 %v399_v32 }
  0x28   : > { %810 = vmatprep.subr.mxu0 %v503_v28  ;;  %782 = vmatpush3.msra.mxu1 %v399_v32 }
  0x29   : > { %811 = vmatpush3.msra.mxu0 %v503_v28  ;;  %783 = vmatprep.subr.mxu1 %v398_v34 }
  0x2a   : > { %812 = vmatprep.subr.mxu0 %v502_v29  ;;  %784 = vmatpush3.msra.mxu1 %v398_v34 }
  0x2b   : > { %813 = vmatpush3.msra.mxu0 %v502_v29  ;;  %785 = vmatprep.subr.mxu1 %v397_v36 }
  0x2c   : > { %814 = vmatprep.subr.mxu0 %v501_v31  ;;  %786 = vmatpush3.msra.mxu1 %v397_v36 }
  0x2d   : > { %815 = vmatpush3.msra.mxu0 %v501_v31 }
  0x2e   : > { %816 = vmatprep.subr.mxu0 %v500_v33 }
  0x2f   : > { %817 = vmatpush3.msra.mxu0 %v500_v33 }
  0x30   : > { %818 = vmatprep.subr.mxu0 %v499_v35 }
  0x31   : > { %819 = vmatpush3.msra.mxu0 %v499_v35 }
  0x32   : > { %820 = vmatprep.subr.mxu0 %v498_v37 }
  0x33   : > { %821 = vmatpush3.msra.mxu0 %v498_v37 }
  0xd4   : > { %v388_v39 = vpop.f32.mrf.mxu0 }
  0xd5   : > { %v389_v40 = vadd.f32 %v700_v38, %v388_v39 }
  0xd6   : > { %v753_v41 = vpop.f32.mrf.mxu0 }
  0xd7   : > { %v395_v42 = vmax.f32 %v389_v40, 0.0 }
  0xd8   : > { %v391_v43 = vpop.f32.mrf.mxu0 }
  0xd9   : > { %v392_v44 = vadd.f32 %v700_v38, %v391_v43  ;;  %787 = vmatprep.mubr.f32.mxu1 %v395_v42  ;;  %822 = vmatprep.mubr.f32.mxu0 %v395_v42 }
  0xda   : > { %v754_v45 = vpop.f32.mrf.mxu0 }
  0xdb   : > { %v396_v46 = vmax.f32 %v392_v44, 0.0 }
  0xdd   : > { %788 = vmatmul.mubr.f32.vlgmr.msra.gmra.mxu1 %v396_v46  ;;  %823 = vmatmul.mubr.f32.vlgmr.msra.gmra.mxu0 %v396_v46 }
 0x19d   : > { %v789_v47 = vpop.f32.mrf.mxu1  ;;  %v824_v48 = vpop.f32.mrf.mxu0 }
 0x19e   : > { %v492_v55 = vadd.f32 %v789_v47, %v704_v49  ;;  %v593_v56 = vadd.f32 %v824_v48, %v705_v50 }
 0x19f   : > { %v486_v51 = vpop.f32.mrf.mxu1  ;;  %v587_v52 = vpop.f32.mrf.mxu0 }
 0x1a0   : > { %v487_v53 = vadd.f32 %v704_v49, %v486_v51  ;;  %v588_v54 = vadd.f32 %v705_v50, %v587_v52  ;;  %497 = vst.msk [vmem:[%s321_s29 + $0x8] sm:$0xff] %vm495_vm2, %v492_v55 }
 0x1a1   : > { %598 = vst.msk [vmem:[%s315_s10 + $0x8] sm:$0xff] %vm596_vm3, %v593_v56 }
 0x1a2   : > { %496 = vst.msk [vmem:[%s321_s29] sm:$0xff] %vm495_vm2, %v487_v53 }
 0x1a3   : > { %597 = vst.msk [vmem:[%s315_s10] sm:$0xff] %vm596_vm3, %v588_v54 }
 0x1a4 PF: > { %s19_s27 = sadd.s32 1, %s843_s27  }
 0x1a5   : > { %p16_p4 = scmp.ge.s32.totalorder %s19_s27, 4  }
 0x1a7   :  { %18 = sbr.rel (!%p16_p4) target bundleno = 1 (0x1), region = 90 }

</bundles_post_ra>
